<compile_context>
chip_gen: v5e
topology: v5e:2x2
jax: 0.10.0
libtpu: 0.0.40
codegen_flags: <defaults>
</compile_context>

<pallas_src>
import functools

import jax
import jax.numpy as jnp
from jax.experimental import pallas as pl
from jax.experimental.pallas import tpu as pltpu


def _batchnorm_kernel(x_ref, gamma_ref, beta_ref, o_ref, *, eps):
    # One (N, TILE_D) column tile: reduce over the batch (sublane) axis,
    # then normalize. All math in f32.
    x = x_ref[...].astype(jnp.float32)                           # (N, TILE_D)
    mean = jnp.mean(x, axis=0, keepdims=True)                    # (1, TILE_D)
    centered = x - mean                                          # (N, TILE_D)
    var = jnp.mean(centered * centered, axis=0, keepdims=True)   # biased var
    inv_std = jax.lax.rsqrt(var + eps)                           # EUP rsqrt
    scale = gamma_ref[...] * inv_std                             # (1, TILE_D)
    out = centered * scale + beta_ref[...]                       # one FMA/elem
    o_ref[...] = out.astype(o_ref.dtype)


def _round_up(v, m):
    return ((v + m - 1) // m) * m


def custom_batchnorm(x, gamma, beta, eps=1e-5):
    """Forward pass of CustomBatchNormAutograd as a Pallas TPU kernel.

    Args:
      x:     (n_batch, n_neurons) float array.
      gamma: (n_neurons,) scale parameter.
      beta:  (n_neurons,) shift parameter.
      eps:   stability constant added to the variance.
    Returns:
      (n_batch, n_neurons) batch-normalized output, same dtype as x.
    """
    n_batch, n_neurons = x.shape
    assert gamma.shape == (n_neurons,) and beta.shape == (n_neurons,), (
        "The shape of the parameters is not correct.")

    # --- Pad the neuron (lane) axis to a multiple of 128 for lane-dense I/O.
    d_pad = _round_up(n_neurons, 128)
    if d_pad != n_neurons:
        pad = d_pad - n_neurons
        x_p = jnp.pad(x, ((0, 0), (0, pad)))
        gamma_p = jnp.pad(gamma.astype(jnp.float32), ((0, pad),),
                          constant_values=1.0)
        beta_p = jnp.pad(beta.astype(jnp.float32), ((0, pad),))
    else:
        x_p = x
        gamma_p = gamma.astype(jnp.float32)
        beta_p = beta.astype(jnp.float32)

    gamma2d = gamma_p.reshape(1, d_pad)
    beta2d = beta_p.reshape(1, d_pad)

    # --- Pick the widest lane tile that divides the padded width (bigger tiles
    #     amortize the ~0.35us/step grid overhead), then shrink if the
    #     double-buffered f32 working set would blow the VMEM budget.
    tile_d = 128
    for cand in (1024, 512, 256):
        if d_pad % cand == 0:
            tile_d = cand
            break
    # Rough budget: 2 input buffers + 2 output buffers of (N, tile_d) in the
    # I/O dtype plus the in-kernel f32 upcast/centered temporaries. Keep the
    # estimate (~5 f32 copies) well under ~12 MiB per tile.
    while tile_d > 128 and n_batch * tile_d * 4 * 5 > 12 * 1024 * 1024:
        tile_d //= 2
    grid = (d_pad // tile_d,)

    tile_bytes = n_batch * tile_d * 4
    vmem_limit = max(16 * 1024 * 1024, min(64 * 1024 * 1024, 8 * tile_bytes))

    kernel = functools.partial(_batchnorm_kernel, eps=float(eps))

    out_padded = pl.pallas_call(
        kernel,
        out_shape=jax.ShapeDtypeStruct((n_batch, d_pad), x.dtype),
        grid_spec=pl.GridSpec(
            grid=grid,
            in_specs=[
                pl.BlockSpec((n_batch, tile_d), lambda j: (0, j)),
                pl.BlockSpec((1, tile_d), lambda j: (0, j)),
                pl.BlockSpec((1, tile_d), lambda j: (0, j)),
            ],
            out_specs=pl.BlockSpec((n_batch, tile_d), lambda j: (0, j)),
        ),
        compiler_params=pltpu.CompilerParams(
            dimension_semantics=("parallel",),
            vmem_limit_bytes=vmem_limit,
        ),
    )(x_p, gamma2d, beta2d)

    if d_pad != n_neurons:
        out_padded = out_padded[:, :n_neurons]
    return out_padded


if __name__ == "__main__":
    n_batch, n_neurons = 8, 32
    eps = 1e-5

    key = jax.random.PRNGKey(0)
    x = jax.random.normal(key, (n_batch, n_neurons), dtype=jnp.float32)

    # Parameter init matching the PyTorch module's __init__:
    # gamma = ones(n_neurons), beta = zeros(n_neurons).
    gamma = jnp.ones((n_neurons,), dtype=jnp.float32)
    beta = jnp.zeros((n_neurons,), dtype=jnp.float32)

    out = custom_batchnorm(x, gamma, beta, eps=eps)
    out = jax.block_until_ready(out)

    # Pure-JAX reference for a sanity check (jnp.var default ddof=0 matches
    # torch.var(unbiased=False)).
    mean = jnp.mean(x, axis=0)
    var = jnp.var(x, axis=0)
    ref = gamma * (x - mean) / jnp.sqrt(var + eps) + beta
    assert out.shape == (n_batch, n_neurons)
    assert jnp.allclose(out, ref, atol=1e-5, rtol=1e-5)

    print("KERNEL_OK")
</pallas_src>

<mosaic_0001>
module attributes {stable_mosaic.version = 11 : i64} {
  func.func @_batchnorm_kernel(%arg0: i32, %arg1: memref<8x128xf32, #tpu.memory_space<vmem>>, %arg2: memref<1x128xf32, #tpu.memory_space<vmem>>, %arg3: memref<1x128xf32, #tpu.memory_space<vmem>>, %arg4: memref<8x128xf32, #tpu.memory_space<vmem>>) attributes {dimension_semantics = [#tpu.dimension_semantics<parallel>], iteration_bounds = array<i64: 1>, scalar_prefetch = 0 : i64, scratch_operands = 0 : i64, tpu.core_type = #tpu.core_type<tc>, window_params = [{transform_indices = @transform_0, window_bounds = array<i64: 8, 128>}, {transform_indices = @transform_1, window_bounds = array<i64: 1, 128>}, {transform_indices = @transform_2, window_bounds = array<i64: 1, 128>}, {transform_indices = @transform_3, window_bounds = array<i64: 8, 128>}]} {
    %c0 = arith.constant 0 : index
    %c0_0 = arith.constant 0 : index
    %0 = vector.load %arg1[%c0, %c0_0] : memref<8x128xf32, #tpu.memory_space<vmem>>, vector<8x128xf32>
    %cst = arith.constant dense<0.000000e+00> : vector<128xf32>
    %1 = vector.multi_reduction <add>, %0, %cst [0] : vector<8x128xf32> to vector<128xf32>
    %2 = vector.shape_cast %1 : vector<128xf32> to vector<1x128xf32>
    %cst_1 = arith.constant 8.000000e+00 : f32
    %3 = vector.broadcast %cst_1 : f32 to vector<1x128xf32>
    %4 = arith.divf %2, %3 : vector<1x128xf32>
    %5 = vector.broadcast %4 : vector<1x128xf32> to vector<8x128xf32>
    %6 = arith.subf %0, %5 : vector<8x128xf32>
    %7 = arith.mulf %6, %6 : vector<8x128xf32>
    %cst_2 = arith.constant dense<0.000000e+00> : vector<128xf32>
    %8 = vector.multi_reduction <add>, %7, %cst_2 [0] : vector<8x128xf32> to vector<128xf32>
    %9 = vector.shape_cast %8 : vector<128xf32> to vector<1x128xf32>
    %cst_3 = arith.constant 8.000000e+00 : f32
    %10 = vector.broadcast %cst_3 : f32 to vector<1x128xf32>
    %11 = arith.divf %9, %10 : vector<1x128xf32>
    %cst_4 = arith.constant 9.99999974E-6 : f32
    %12 = vector.broadcast %cst_4 : f32 to vector<1x128xf32>
    %13 = arith.addf %11, %12 : vector<1x128xf32>
    %14 = math.rsqrt %13 : vector<1x128xf32>
    %c0_5 = arith.constant 0 : index
    %c0_6 = arith.constant 0 : index
    %15 = vector.load %arg2[%c0_5, %c0_6] : memref<1x128xf32, #tpu.memory_space<vmem>>, vector<1x128xf32>
    %16 = arith.mulf %15, %14 : vector<1x128xf32>
    %17 = vector.broadcast %16 : vector<1x128xf32> to vector<8x128xf32>
    %18 = arith.mulf %6, %17 : vector<8x128xf32>
    %c0_7 = arith.constant 0 : index
    %c0_8 = arith.constant 0 : index
    %19 = vector.load %arg3[%c0_7, %c0_8] : memref<1x128xf32, #tpu.memory_space<vmem>>, vector<1x128xf32>
    %20 = vector.broadcast %19 : vector<1x128xf32> to vector<8x128xf32>
    %21 = arith.addf %18, %20 : vector<8x128xf32>
    %c0_9 = arith.constant 0 : index
    %c0_10 = arith.constant 0 : index
    %22 = vector.load %arg4[%c0_9, %c0_10] : memref<8x128xf32, #tpu.memory_space<vmem>>, vector<8x128xf32>
    tpu.vector_store %arg4[%c0_9, %c0_10], %21 {strides = array<i32>} : memref<8x128xf32, #tpu.memory_space<vmem>>, vector<8x128xf32>,
    return
  }
  func.func @transform_0(%arg0: i32) -> (i32, i32) {
    %c0_i32 = arith.constant 0 : i32
    %c0_i32_0 = arith.constant 0 : i32
    return %c0_i32, %arg0 : i32, i32
  }
  func.func @transform_1(%arg0: i32) -> (i32, i32) {
    %c0_i32 = arith.constant 0 : i32
    %c0_i32_0 = arith.constant 0 : i32
    return %c0_i32, %arg0 : i32, i32
  }
  func.func @transform_2(%arg0: i32) -> (i32, i32) {
    %c0_i32 = arith.constant 0 : i32
    %c0_i32_0 = arith.constant 0 : i32
    return %c0_i32, %arg0 : i32, i32
  }
  func.func @transform_3(%arg0: i32) -> (i32, i32) {
    %c0_i32 = arith.constant 0 : i32
    %c0_i32_0 = arith.constant 0 : i32
    return %c0_i32, %arg0 : i32, i32
  }
}

</mosaic_0001>

<bundles_post_ra>
// kernel: tpu_custom_call.1
= control target key start
LH: loop header
LB: loop body
LE: loop exit
PB: predicated region body
PF: predicated region fallthrough
CT: control target
= control target key end

     0   :  { %8 = vsyncpa [#allocation3], 0  ;;  %s231_s0 = inlined_call_operand.hbm [shape: f32[8,128], index: 0, kind: input, shape index: {}]   ;;  %s232_s1 = inlined_call_operand.hbm [shape: f32[1,128], index: 1, kind: input, shape index: {}]   ;;  %s233_s2 = inlined_call_operand.vmem [shape: f32[1,128], index: 2, kind: input, shape index: {}]   ;;  %s234_s3 = inlined_call_operand.hbm [shape: f32[8,128], index: 3, kind: output, shape index: {}]  }
   0x1   :  { %9 = vsyncpa [#allocation6], 0 }
   0x2   :  { %10 = vsyncpa [#allocation4], 0  ;;  %s16_s14 = sshll.u32 %s231_s0, 4  ;;  %s195_s15 = smov [#allocation2]   ;;  %s17_s14 = int_to_ptr.hbm [resolvable:$true] %s16_s14 }
   0x3   :  { %s18_s16 = sshll.u32 %s195_s15, 4  ;;  %s27_s19 = sshll.u32 %s232_s1, 4  ;;  %s19_s16 = int_to_ptr.vmem [resolvable:$true] %s18_s16  ;;  %s28_s19 = int_to_ptr.hbm [resolvable:$true] %s27_s19 }
   0x4   :  { %21 = dma.hbm_to_vmem [thread:$0]  %s17_s14, 128, %s19_s16, [#allocation3]  }
   0x5   :  { %s196_s20 = smov [#allocation5]  }
   0x6   :  { %s29_s21 = sshll.u32 %s196_s20, 4  ;;  %s30_s21 = int_to_ptr.vmem [resolvable:$true] %s29_s21 }
   0x7   :  { %32 = dma.hbm_to_vmem [thread:$0]  %s28_s19, 16, %s30_s21, [#allocation6]  }
   0x8   :  { %189 = dma.done.wait [#allocation3], 128  }
   0x9   :  { %190 = vsyncadd [#allocation3], 4294967168 }
   0xa   :  { %191 = dma.done.wait [#allocation6], 16  }
   0xb   :  { %192 = vsyncadd [#allocation6], 4294967280  ;;  %v197_v0 = vmov 8.0   ;;  %v43_v2 = vld [vmem:[#allocation2] sm:$0xff]  ;;  %v78_v31 = vld [vmem:[#allocation5] sm:$0x1] }
   0xc   :  { %113 = vrcp.f32 %v197_v0  ;;  %v44_v3 = vrot.slane %v43_v2, 4  ;;  %v112_v35 = vld [vmem:[%s233_s2] ss:$0 sm:$0xff]  ;;  %s198_s22 = smov [#allocation7]   ;;  %s97_s26 = sshll.u32 %s234_s3, 4  ;;  %s98_s26 = int_to_ptr.hbm [resolvable:$true] %s97_s26 }
   0xd   :  { %s95_s23 = sshll.u32 %s198_s22, 4  ;;  %s96_s23 = int_to_ptr.vmem [resolvable:$true] %s95_s23 }
   0xe   :  { %v45_v5 = vadd.f32 %v44_v3, %v43_v2 }
  0x10   :  { %v46_v7 = vrot.slane %v45_v5, 2 }
  0x12   :  { %v114_v1 = vpop.eup %113  ;;  %v47_v9 = vadd.f32 %v46_v7, %v45_v5 }
  0x13   :  { %v51_v4 = vmul.f32 8.0, %v114_v1  ;;  %vm55_vm0 = vweird.f32 %v114_v1 }
  0x14   :  { %v48_v11 = vrot.slane %v47_v9, 1 }
  0x15   :  { %v52_v6 = vsub.f32 1.0, %v51_v4 }
  0x16   :  { %v49_v13 = vadd.f32 %v48_v11, %v47_v9 }
  0x17   :  { %v53_v8 = vmul.f32 %v114_v1, %v52_v6 }
  0x19   :  { %v54_v10 = vadd.f32 %v114_v1, %v53_v8 }
  0x1b   :  { %v56_v12 = vsel %vm55_vm0, %v114_v1, %v54_v10 }
  0x1c   :  { %v57_v14 = vmul.f32 %v56_v12, %v49_v13 }
  0x1e   :  { %v58_v15 = vsub.f32 %v43_v2, %v57_v14 }
  0x20   :  { %v59_v16 = vmul.f32 %v58_v15, %v58_v15 }
  0x22   :  { %v60_v17 = vrot.slane %v59_v16, 4 }
  0x24   :  { %v61_v18 = vadd.f32 %v60_v17, %v59_v16 }
  0x26   :  { %v62_v19 = vrot.slane %v61_v18, 2 }
  0x28   :  { %v63_v20 = vadd.f32 %v62_v19, %v61_v18 }
  0x2a   :  { %v64_v21 = vrot.slane %v63_v20, 1 }
  0x2c   :  { %v65_v22 = vadd.f32 %v64_v21, %v63_v20 }
  0x2e   :  { %v66_v23 = vmul.f32 %v65_v22, %v56_v12 }
  0x30   :  { %v67_v24 = vadd.f32 1e-05, %v66_v23 }
  0x32   :  { %115 = vrsqrt.f32 %v67_v24  ;;  %vm74_vm1 = vweird.f32 %v67_v24 }
  0x38   :  { %v116_v25 = vpop.eup %115 }
  0x39   :  { %v69_v26 = vmul.f32 %v116_v25, %v67_v24  ;;  %vm75_vm2 = vweird.f32 %v116_v25 }
  0x3a   :  { %vm76_vm3 = vmor %vm74_vm1, %vm75_vm2 }
  0x3b   :  { %v70_v27 = vmul.f32 %v116_v25, %v69_v26 }
  0x3d   :  { %v71_v28 = vmul.f32 0.5, %v70_v27 }
  0x3f   :  { %v72_v29 = vsub.f32 1.5, %v71_v28 }
  0x41   :  { %v73_v30 = vmul.f32 %v116_v25, %v72_v29 }
  0x43   :  { %v77_v32 = vsel %vm76_vm3, %v116_v25, %v73_v30 }
  0x44   :  { %v79_v33 = vmul.f32 %v78_v31, %v77_v32 }
  0x46   :  { %v81_v34 = vperm.slane %v79_v33, 0 }
  0x48   :  { %v83_v36 = vmul.f32 %v81_v34, %v58_v15 }
  0x4a   :  { %v88_v37 = vadd.f32 %v112_v35, %v83_v36 }
  0x4c   :  { %89 = vst [vmem:[#allocation7] sm:$0xff] %v88_v37 }
  0x4d   :  { %100 = dma.vmem_to_hbm [thread:$0]  %s96_s23, 128, %s98_s26, [#allocation4]  }
  0x4e   :  { %193 = dma.done.wait [#allocation4], 128  }
  0x4f   :  { %194 = vsyncadd [#allocation4], 4294967168 }
  0x50   :  { %105 = vsyncpa [#allocation3], 1 }
  0x51   :  { %106 = vsyncpa [#allocation6], 1 }
  0x52   :  { %107 = vsyncpa [#allocation4], 1 }

</bundles_post_ra>
